<compile_context>
chip_gen: v7x
topology: tpu7x:2x2x1
jax: 0.10.0
libtpu: 0.0.40
codegen_flags: <defaults>
</compile_context>

<pallas_src>
import functools

import jax
import jax.numpy as jnp
from jax.experimental import pallas as pl
from jax.experimental.pallas import tpu as pltpu


def _round_up(v: int, m: int) -> int:
    return (v + m - 1) // m * m


# --------------------------------------------------------------------------
# Kernel 1: per-relation feature transform  xw[r] = x @ W_r   (bf16 out)
# --------------------------------------------------------------------------
def _xw_kernel(x_ref, w_ref, xw_ref):
    xw_ref[...] = jnp.dot(
        x_ref[...], w_ref[...], preferred_element_type=jnp.float32
    ).astype(xw_ref.dtype)


def relation_transform(x_bf, w_rel_bf, *, tile_m):
    """x_bf: [N, Cin] bf16, w_rel_bf: [R, Cin, Cout] bf16 -> [R, N, Cout] bf16."""
    N, Cin = x_bf.shape
    R, _, Cout = w_rel_bf.shape
    num_tiles = N // tile_m
    return pl.pallas_call(
        _xw_kernel,
        out_shape=jax.ShapeDtypeStruct((R, N, Cout), jnp.bfloat16),
        grid=(num_tiles, R),
        in_specs=[
            pl.BlockSpec((tile_m, Cin), lambda i, r: (i, 0)),
            pl.BlockSpec((None, Cin, Cout), lambda i, r: (r, 0, 0)),
        ],
        out_specs=pl.BlockSpec((None, tile_m, Cout), lambda i, r: (r, i, 0)),
        compiler_params=pltpu.CompilerParams(
            dimension_semantics=("parallel", "parallel")),
    )(x_bf, w_rel_bf)


# --------------------------------------------------------------------------
# Kernel 2: tiled relational aggregation
#   out[i] = x[i] @ W_root + b + sum_r inv_deg[r,i] * sum_k C_r[i,k] @ xw[r,k]
# grid = (dst row tiles [parallel], relations [arbitrary], K tiles [arbitrary])
# xw is VMEM-resident (constant-index full block); adjacency streams as int8.
# --------------------------------------------------------------------------
def _make_agg_kernel(n_rows: int, tile_k: int, apply_relu: bool):
    def kernel(x_ref, root_ref, bias_ref, invdeg_ref, xw_ref, adj_ref,
               out_ref, acc_ref):
        r = pl.program_id(1)
        k = pl.program_id(2)
        last_r = pl.num_programs(1) - 1
        last_k = pl.num_programs(2) - 1

        # Init accumulator with the root/self transform + bias on the first
        # reduction step (accumulator is VMEM scratch, resident across r, k).
        @pl.when((r == 0) & (k == 0))
        def _():
            acc_ref[...] = (
                jnp.dot(x_ref[...], root_ref[...],
                        preferred_element_type=jnp.float32)
                + bias_ref[...]
            )

        # Partial message passing for this (relation, K-tile):
        #   inv_deg[r, i_tile] * (C_r[i_tile, k_tile] @ xw[r, k_tile])
        # xw is a single resident VMEM block laid out as [(r, row), Cout].
        off = pl.multiple_of(r * n_rows + k * tile_k, 128)
        xw_blk = xw_ref[pl.ds(off, tile_k), :]                 # (tile_k, Cout)
        mask = adj_ref[...].astype(jnp.bfloat16)               # (tile_m, tile_k)
        acc_ref[...] += invdeg_ref[...] * jnp.dot(
            mask, xw_blk, preferred_element_type=jnp.float32)

        @pl.when((r == last_r) & (k == last_k))
        def _():
            res = acc_ref[...]
            if apply_relu:
                res = jnp.maximum(res, 0.0)
            out_ref[...] = res.astype(out_ref.dtype)

    return kernel


def rgcn_layer(x_bf, w_root, bias, w_rel, adj_mask_i8, inv_deg,
               *, apply_relu: bool, tile_m: int, tile_k: int):
    """x_bf: [N, Cin] bf16 (N % tile_m == N % tile_k == 0),
    w_root: [Cin, Cout] f32, bias: [1, Cout] f32, w_rel: [R, Cin, Cout] f32,
    adj_mask_i8: [R, N, N] int8 edge counts, inv_deg: [R, N, 1] f32
    -> [N, Cout] bf16."""
    N, Cin = x_bf.shape
    Cout = w_root.shape[1]
    R = w_rel.shape[0]
    num_m = N // tile_m
    num_k = N // tile_k

    # Hoisted per-relation feature transform (computed once per layer), then
    # flattened to [(r, row), Cout] so the agg kernel slices it with one pl.ds.
    xw = relation_transform(x_bf, w_rel.astype(jnp.bfloat16), tile_m=tile_m)
    xw2d = xw.reshape(R * N, Cout)

    flops = 2 * N * Cin * Cout + 2 * R * N * N * Cout
    bytes_accessed = (R * N * N * 1            # adjacency mask (int8)
                      + R * N * Cout * 2       # resident xw (fetched once)
                      + N * Cin * 2            # x
                      + R * N * 4              # inv_deg
                      + Cin * Cout * 2         # W_root
                      + N * Cout * 2)          # output

    # VMEM footprint (double-buffered blocks + resident xw + f32 accumulator),
    # used to derive an explicit limit that stays within v7x's 64 MiB budget.
    vmem_bytes = (
        2 * tile_m * tile_k * 1                # adjacency int8 blocks
        + 2 * R * N * Cout * 2                 # resident xw (bf16)
        + 2 * tile_m * Cin * 2                 # x tile
        + 2 * Cin * Cout * 2                   # W_root
        + 2 * 8 * max(Cout, 128) * 4           # bias (layout padded)
        + 2 * tile_m * 128 * 4                 # inv_deg (lane padded)
        + 2 * tile_m * Cout * 2                # out tile
        + tile_m * Cout * 4                    # acc scratch
    )
    vmem_limit = min(int(1.5 * vmem_bytes) + (8 << 20), 112 << 20)
    vmem_limit = max(vmem_limit, 24 << 20)

    return pl.pallas_call(
        _make_agg_kernel(N, tile_k, apply_relu),
        out_shape=jax.ShapeDtypeStruct((N, Cout), jnp.bfloat16),
        grid=(num_m, R, num_k),
        in_specs=[
            pl.BlockSpec((tile_m, Cin), lambda i, r, k: (i, 0)),        # x tile
            pl.BlockSpec((Cin, Cout), lambda i, r, k: (0, 0)),          # W_root
            pl.BlockSpec((1, Cout), lambda i, r, k: (0, 0)),            # bias
            pl.BlockSpec((None, tile_m, 1), lambda i, r, k: (r, i, 0)), # 1/deg
            pl.BlockSpec((R * N, Cout), lambda i, r, k: (0, 0)),        # xw (resident)
            pl.BlockSpec((None, tile_m, tile_k),
                         lambda i, r, k: (r, i, k)),                    # C_r tile
        ],
        out_specs=pl.BlockSpec((tile_m, Cout), lambda i, r, k: (i, 0)),
        scratch_shapes=[pltpu.VMEM((tile_m, Cout), jnp.float32)],
        compiler_params=pltpu.CompilerParams(
            dimension_semantics=("parallel", "arbitrary", "arbitrary"),
            vmem_limit_bytes=vmem_limit),
        cost_estimate=pl.CostEstimate(flops=flops, transcendentals=0,
                                      bytes_accessed=bytes_accessed),
    )(x_bf, w_root.astype(jnp.bfloat16), bias, inv_deg, xw2d, adj_mask_i8)


# --------------------------------------------------------------------------
# Plain-JAX glue: dense edge counts + inv-degree, param init, model forward.
# --------------------------------------------------------------------------
def build_relation_adjacency(edge_index, edge_type, num_nodes, num_relations):
    """Dense per-relation edge-count matrix C[r, dst, src] (f32) and the
    factored-out mean-normalization 1/deg[r, dst] (f32). Padded (edge-less)
    rows/cols stay exactly zero."""
    src, dst = edge_index[0], edge_index[1]
    counts = jnp.zeros((num_relations, num_nodes, num_nodes), jnp.float32)
    counts = counts.at[edge_type, dst, src].add(1.0)
    deg = counts.sum(axis=-1, keepdims=True)         # in-degree per relation
    inv_deg = 1.0 / jnp.maximum(deg, 1.0)             # mean aggregation scale
    return counts, inv_deg


def init_params(key, in_channels, hidden_channels, num_relations, num_layers):
    """Deterministic parameter init (Glorot-ish) for the layer stack."""
    params = []
    c_in = in_channels
    for _ in range(num_layers):
        key, k1, k2 = jax.random.split(key, 3)
        scale = 1.0 / jnp.sqrt(jnp.float32(c_in))
        params.append({
            "w_rel": jax.random.normal(
                k1, (num_relations, c_in, hidden_channels), jnp.float32) * scale,
            "w_root": jax.random.normal(
                k2, (c_in, hidden_channels), jnp.float32) * scale,
            "bias": jnp.zeros((1, hidden_channels), jnp.float32),
        })
        c_in = hidden_channels
    return params


def base_relational_model_forward(params, x, edge_index, edge_type,
                                  num_relations, *, tile_m=256, tile_k=1024):
    """Mirrors BaseRelationalModel.forward (eval mode => dropout is identity).
    Note: features/weights run in bf16 with f32 accumulation (intentional)."""
    num_nodes = x.shape[0]

    # Lane-align N to 128 (adjacency last dim / xw rows), pick the row tile.
    n_pad = _round_up(num_nodes, 128)
    if n_pad <= tile_m:
        # Split the row axis so both v7x TensorCores get a "parallel" tile.
        tile_m_eff = max(n_pad // 2, 64)
    else:
        tile_m_eff = tile_m
    n_pad = _round_up(n_pad, tile_m_eff)
    # Source/K tile must divide n_pad; fall back to the row tile otherwise.
    tile_k_eff = min(tile_k, n_pad)
    if n_pad % tile_k_eff != 0:
        tile_k_eff = tile_m_eff

    counts, inv_deg = build_relation_adjacency(edge_index, edge_type, n_pad,
                                               num_relations)
    adj_mask = counts.astype(jnp.int8)   # small integer edge multiplicities
    h = jnp.pad(x, ((0, n_pad - num_nodes), (0, 0))).astype(jnp.bfloat16)

    num_layers = len(params)
    for i, p in enumerate(params):
        last = (i == num_layers - 1)
        # ReLU is fused into the kernel for all but the last layer.
        h = rgcn_layer(h, p["w_root"], p["bias"], p["w_rel"], adj_mask, inv_deg,
                       apply_relu=not last, tile_m=tile_m_eff, tile_k=tile_k_eff)
        # F.dropout(training=False) -> identity
    return h[:num_nodes].astype(jnp.float32)


def reference_forward(params, x, edge_index, edge_type, num_relations):
    """Plain-JAX f32 reference for sanity checking."""
    counts, inv_deg = build_relation_adjacency(edge_index, edge_type,
                                               x.shape[0], num_relations)
    adj = counts * inv_deg
    h = x
    n = len(params)
    for i, p in enumerate(params):
        xw = jnp.einsum("nk,rkc->rnc", h, p["w_rel"])
        out = h @ p["w_root"] + p["bias"] + jnp.einsum("rnm,rmc->nc", adj, xw)
        if i != n - 1:
            out = jnp.maximum(out, 0.0)
        h = out
    return h


if __name__ == "__main__":
    # Small, module-consistent shapes (Cout lane-dense = 128, N padded to 512).
    num_nodes = 500
    in_channels = 16
    hidden_channels = 128
    num_relations = 3
    num_layers = 3
    num_edges = 2048

    key = jax.random.PRNGKey(0)
    k_x, k_src, k_dst, k_rel, k_params = jax.random.split(key, 5)

    x = jax.random.normal(k_x, (num_nodes, in_channels), jnp.float32)
    edge_index = jnp.stack([
        jax.random.randint(k_src, (num_edges,), 0, num_nodes),
        jax.random.randint(k_dst, (num_edges,), 0, num_nodes),
    ], axis=0).astype(jnp.int32)
    edge_type = jax.random.randint(
        k_rel, (num_edges,), 0, num_relations).astype(jnp.int32)

    params = init_params(k_params, in_channels, hidden_channels,
                         num_relations, num_layers)

    fwd = functools.partial(base_relational_model_forward,
                            num_relations=num_relations)
    out = fwd(params, x, edge_index, edge_type)
    out = jax.block_until_ready(out)

    ref = reference_forward(params, x, edge_index, edge_type, num_relations)
    assert out.shape == (num_nodes, hidden_channels)

    # bf16 data path vs f32 reference: check normalized max error.
    max_ref = float(jnp.max(jnp.abs(ref)))
    max_err = float(jnp.max(jnp.abs(out - ref)))
    assert max_err <= 0.05 * max_ref + 1e-3, (max_err, max_ref)

    print("KERNEL_OK")
</pallas_src>

<mosaic_0001>
module attributes {stable_mosaic.version = 11 : i64} {
  func.func @_xw_kernel(%arg0: i32, %arg1: i32, %arg2: memref<256x16xbf16, #tpu.memory_space<vmem>>, %arg3: memref<1x16x128xbf16, #tpu.memory_space<vmem>>, %arg4: memref<1x256x128xbf16, #tpu.memory_space<vmem>>) attributes {dimension_semantics = [#tpu.dimension_semantics<parallel>, #tpu.dimension_semantics<parallel>], iteration_bounds = array<i64: 2, 3>, scalar_prefetch = 0 : i64, scratch_operands = 0 : i64, tpu.core_type = #tpu.core_type<tc>, window_params = [{transform_indices = @transform_0, window_bounds = array<i64: 256, 16>}, {transform_indices = @transform_1, window_bounds = array<i64: 1, 16, 128>}, {transform_indices = @transform_2, window_bounds = array<i64: 1, 256, 128>}]} {
    %c0 = arith.constant 0 : index
    %c0_0 = arith.constant 0 : index
    %0 = vector.load %arg2[%c0, %c0_0] : memref<256x16xbf16, #tpu.memory_space<vmem>>, vector<256x16xbf16>
    %c0_1 = arith.constant 0 : index
    %c0_2 = arith.constant 0 : index
    %c0_3 = arith.constant 0 : index
    %1 = vector.load %arg3[%c0_1, %c0_2, %c0_3] : memref<1x16x128xbf16, #tpu.memory_space<vmem>>, vector<1x16x128xbf16>
    %2 = vector.shape_cast %1 : vector<1x16x128xbf16> to vector<16x128xbf16>
    %cst = arith.constant dense<0.000000e+00> : vector<256x128xf32>
    %3 = tpu.matmul %0, %2, %cst {dimension_numbers = #tpu.dot_dimension_numbers<[1], [0], [0], [1], [0, 0, 1, 1], [], []>} : vector<256x16xbf16>, vector<16x128xbf16>, vector<256x128xf32> -> vector<256x128xf32>
    %4 = arith.truncf %3 : vector<256x128xf32> to vector<256x128xbf16>
    %c0_4 = arith.constant 0 : index
    %c0_5 = arith.constant 0 : index
    %c0_6 = arith.constant 0 : index
    %5 = vector.load %arg4[%c0_4, %c0_5, %c0_6] : memref<1x256x128xbf16, #tpu.memory_space<vmem>>, vector<1x256x128xbf16>
    %6 = vector.shape_cast %5 : vector<1x256x128xbf16> to vector<256x128xbf16>
    %7 = vector.shape_cast %4 : vector<256x128xbf16> to vector<1x256x128xbf16>
    tpu.vector_store %arg4[%c0_4, %c0_5, %c0_6], %7 {strides = array<i32>} : memref<1x256x128xbf16, #tpu.memory_space<vmem>>, vector<1x256x128xbf16>,
    return
  }
  func.func @transform_0(%arg0: i32, %arg1: i32) -> (i32, i32) {
    %c0_i32 = arith.constant 0 : i32
    %c0_i32_0 = arith.constant 0 : i32
    return %arg0, %c0_i32 : i32, i32
  }
  func.func @transform_1(%arg0: i32, %arg1: i32) -> (i32, i32, i32) {
    %c0_i32 = arith.constant 0 : i32
    %c0_i32_0 = arith.constant 0 : i32
    %c0_i32_1 = arith.constant 0 : i32
    return %arg1, %c0_i32, %c0_i32_0 : i32, i32, i32
  }
  func.func @transform_2(%arg0: i32, %arg1: i32) -> (i32, i32, i32) {
    %c0_i32 = arith.constant 0 : i32
    %c0_i32_0 = arith.constant 0 : i32
    return %arg1, %arg0, %c0_i32 : i32, i32, i32
  }
}

</mosaic_0001>

<bundles_post_ra>
// kernel: tpu_custom_call.1
= control target key start
LH: loop header
LB: loop body
LE: loop exit
PB: predicated region body
PF: predicated region fallthrough
CT: control target
= control target key end

     0   :  { %7 = vsyncpa [#allocation3], 0  ;;  %s1443_s0 = inlined_call_operand.vmem [shape: bf16[512,16], index: 0, kind: input, shape index: {}]   ;;  %s1444_s1 = inlined_call_operand.vmem [shape: bf16[3,16,128], index: 1, kind: input, shape index: {}]   ;;  %s1445_s2 = inlined_call_operand.hbm [shape: bf16[3,512,128], index: 2, kind: output, shape index: {}]  }
   0x1   :  { %9 = vsyncpa [#allocation3 + $0x1], 0  ;;  %s1240_s9 = smov 0   ;;  %s1242_s10 = smov 0  }
   0x2   :  { %s1244_s11 = smov 0   ;;  %s1246_s12 = smov 0  }
   0x3   :  { %s1248_s13 = smov 0   ;;  %s1250_s14 = smov 0  }
   0x4   :  { %s1252_s15 = smov 0   ;;  %s1254_s16 = smov 0  }
   0x5 LB: > { %s774_s17 = sadd.s32 4294967295, %s1220_s16   ;;  %s775_s18 = sadd.s32 4294967294, %s1220_s16   ;;  %s1220_s16 = sphi %s1254_s16, %s15_s16   ;;  %s1216_s15 = sphi %s1252_s15, %s1454_s15   ;;  %s1212_s14 = sphi %s1250_s14, %s1453_s14   ;;  %s1208_s13 = sphi %s1248_s13, %s1452_s13   ;;  %s1204_s12 = sphi %s1246_s12, %s1451_s12   ;;  %s1200_s11 = sphi %s1244_s11, %s1450_s11   ;;  %s1196_s10 = sphi %s1242_s10, %s1449_s10   ;;  %s1192_s9 = sphi %s1240_s9, %s1448_s9  }
   0x6   : > { %s24_s19 = sadd.s32 1, %s1212_s14  ;;  %s27_s20 = sadd.s32 1, %s1216_s15 }
   0x7   : > { %p25_p0 = scmp.ge.s32.totalorder %s24_s19, 3  ;;  %p98_p1 = scmp.ne.s32.totalorder %s1200_s11, %s1196_s10 }
   0x8   : > { %p99_p2 = scmp.eq.s32.totalorder %s774_s17, 5  ;;  %p104_p5 = scmp.ne.s32.totalorder %s1196_s10, %s1192_s9 }
   0x9   : > { %s1456_s19 = smov (%p25_p0, %s24_s19), 0  ;;  %s1458_s20 = smov (!%p25_p0, %s27_s20), %s1216_s15 }
   0xa   : > { %s83_s21 = ssub.s32 %s1212_s14, %s1456_s19  ;;  %p1291_p3 = por %p99_p2, %p98_p1 }
   0xb   : > { %p29_p4 = scmp.ge.s32.totalorder %s1458_s20, 2  ;;  %p105_p6 = scmp.eq.s32.totalorder %s775_s18, 5 }
   0xc   : > { %p778_p7 = scmp.ge.s32.totalorder %s1220_s16, 1  ;;  %p140_p9 = scmp.lt.s32.totalorder %s1220_s16, 7 }
   0xd   : > { %s1460_s20 = smov (%p29_p4, %s1458_s20), 0  ;;  %p1300_p8 = por %p105_p6, %p104_p5 }
   0xe   : > { %s84_s24 = ssub.s32 %s1216_s15, %s1460_s20  ;;  %s88_s25 = sadd.s32 1, %s1200_s11 }
   0xf   : > { %s85_s26 = sor.u32 %s84_s24, %s83_s21  ;;  %p141_p10 = pnand %p778_p7, %p140_p9 }
  0x10   : > { %p86_p11 = scmp.eq.s32.totalorder %s85_s26, 0  ;;  %p173_p12 = scmp.lt.s32.totalorder (!%p141_p10), %s1204_s12, 2  ;;  %vm300_vm0 = vcmask (!%p141_p10), 130048  }
  0x11   : > { %144 = sbr.rel (%p141_p10) target bundleno = 289 (0x121), region = 28  ;;  %s1313_s28 = sshll.u32 (!%p141_p10), %s1208_s13, 5 }
  0x12   : > { %s1309_s27 = scalar_select %p86_p11, %s1200_s11, %s88_s25  }
  0x13   : > { %p168_p13 = scmp.lt.s32.totalorder (!%p141_p10), %s1313_s28, 63  ;;  %s164_s13 = sand.u32 (!%p141_p10), 1, %s1196_s10  }
  0x14   : > { %s779_s21 = sshll.u32 (!%p141_p10), %s164_s13, 7  ;;  %s851_s25 = sshll.u32 (!%p141_p10), %s1204_s12, 6 }
  0x15   : > { %s1361_s24 = scalar_lea.vmem (!%p141_p10), [#allocation2], %s779_s21  ;;  %s683_s26 = sadd.s32 (!%p141_p10), %s851_s25, %s1313_s28 }
  0x16   : > { %s1391_s4 = scalar_lea.sflag (!%p141_p10), [#allocation3], %s164_s13 }
  0x18   : > { %s174_s29 = scalar_select %p173_p12, %s1204_s12, 2 }
  0x19   : > { %s169_s30 = scalar_select %p168_p13, %s1313_s28, 63 }
  0x1a   : > { %s855_s3 = sshll.u32 %s174_s29, 3  ;;  %s852_s29 = sshll.u32 %s683_s26, 6 }
  0x1b   : > { %s177_s6 = scalar_lea.vmem %s1444_s1, %s855_s3  ;;  %s781_s7 = sshll.u32 %s169_s30, 2 }
  0x1c   : > { %v1109_v0 = vld [vmem:[%s177_s6] sm:$0xff]   ;;  %s1324_s18 = scalar_lea.vmem %s1443_s0, %s781_s7  ;;  %s686_s30 = sshll.u32 %s1361_s24, 4  ;;  %s1383_s30 = int_to_ptr.vmem [resolvable:$true] %s686_s30 }
  0x1d   : > { %v1110_v1 = vld [vmem:[%s1324_s18] sm:$0xff]   ;;  %1000 = vmatprep.subr.bf16.mxu0 %v1109_v0  ;;  %1034 = vmatprep.subr.bf16.mxu1 %v1109_v0  ;;  %v1112_v3 = vld [vmem:[%s1324_s18 + $0x8] sm:$0xff]   ;;  %v1114_v5 = vld [vmem:[%s1324_s18 + $0x10] sm:$0xff]   ;;  %s1381_s3 = scalar_lea.hbm %s1445_s2, %s852_s29  ;;  %s1126_s5 = scalar_lea.vmem %s1383_s30, 2048 }
  0x1e   : > { %v1111_v2 = vld [vmem:[%s1324_s18 + $0x40] sm:$0xff]   ;;  %1001 = vmatpush3.bf16.msra.mxu0 %v1109_v0  ;;  %1035 = vmatpush3.bf16.msra.mxu1 %v1109_v0  ;;  %v1113_v4 = vld [vmem:[%s1324_s18 + $0x48] sm:$0xff]   ;;  %v1115_v6 = vld [vmem:[%s1324_s18 + $0x50] sm:$0xff]   ;;  %p1127_p0 = scmp.ne.s32.totalorder %s1383_s30, %s1126_s5  ;;  %s1222_s6 = smov [#allocation2]  }
  0x1f   : > { %1002 = vmatprep.mubr.msk.bf16.mxu0 %vm300_vm0, %v1110_v1  ;;  %1018 = vmatprep.mubr.msk.bf16.mxu1 %vm300_vm0, %v1111_v2  ;;  %v1116_v7 = vld [vmem:[%s1324_s18 + $0x18] sm:$0xff]   ;;  %v1118_v9 = vld [vmem:[%s1324_s18 + $0x20] sm:$0xff]   ;;  %v1120_v11 = vld [vmem:[%s1324_s18 + $0x28] sm:$0xff]   ;;  %s1130_s7 = sshll.u32 %s1222_s6, 4  ;;  %s1131_s7 = int_to_ptr.vmem [resolvable:$false] %s1130_s7 }
  0x20   : > { %v1117_v8 = vld [vmem:[%s1324_s18 + $0x58] sm:$0xff]   ;;  %v1119_v10 = vld [vmem:[%s1324_s18 + $0x60] sm:$0xff]   ;;  %v1121_v12 = vld [vmem:[%s1324_s18 + $0x68] sm:$0xff]   ;;  %p1128_p1 = pnand %p1127_p0, %p1291_p3  ;;  %s1132_s8 = scalar_lea.vmem %s1131_s7, 4096 }
  0x21   : > { %1003 = vmatmul.mubr.msk.bf16.vlgmr.msra.gmra.mrb[0].mxu0 %vm300_vm0, %v1112_v3  ;;  %1019 = vmatmul.mubr.msk.bf16.vlgmr.msra.gmra.mrb[0].mxu1 %vm300_vm0, %v1113_v4  ;;  %v1122_v13 = vld [vmem:[%s1324_s18 + $0x30] sm:$0xff]   ;;  %v1124_v15 = vld [vmem:[%s1324_s18 + $0x38] sm:$0xff]   ;;  %p1133_p4 = scmp.lt.s32.totalorder %s1383_s30, %s1131_s7  ;;  %p1134_p5 = scmp.lt.s32.totalorder %s1132_s8, %s1126_s5 }
  0x22   : > { %1006 = vmatprep.mubr.msk.bf16.mxu0 %vm300_vm0, %v1114_v5  ;;  %1022 = vmatprep.mubr.msk.bf16.mxu1 %vm300_vm0, %v1115_v6  ;;  %v1123_v14 = vld [vmem:[%s1324_s18 + $0x70] sm:$0xff]   ;;  %v1125_v16 = vld [vmem:[%s1324_s18 + $0x78] sm:$0xff]   ;;  %p1129_p2 = pneg %p1128_p1 }
  0x23   : > { %p1135_p6 = por %p1134_p5, %p1133_p4 }
  0x25   : > { %p1136_p7 = pnand %p1135_p6, %p1129_p2 }
  0x29   : > { %1007 = vmatmul.mubr.msk.bf16.gmra.mrb[4].mxu0 %vm300_vm0, %v1116_v7  ;;  %1023 = vmatmul.mubr.msk.bf16.gmra.mrb[4].mxu1 %vm300_vm0, %v1117_v8 }
  0x2a   : > { %1010 = vmatprep.mubr.msk.bf16.mxu0 %vm300_vm0, %v1118_v9  ;;  %1026 = vmatprep.mubr.msk.bf16.mxu1 %vm300_vm0, %v1119_v10 }
  0x31   : > { %1011 = vmatmul.mubr.msk.bf16.gmra.mrb[8].mxu0 %vm300_vm0, %v1120_v11  ;;  %1027 = vmatmul.mubr.msk.bf16.gmra.mrb[8].mxu1 %vm300_vm0, %v1121_v12 }
  0x32   : > { %1014 = vmatprep.mubr.msk.bf16.mxu0 %vm300_vm0, %v1122_v13  ;;  %1030 = vmatprep.mubr.msk.bf16.mxu1 %vm300_vm0, %v1123_v14 }
  0x39   : > { %1015 = vmatmul.mubr.msk.bf16.gmra.mrb[12].mxu0 %vm300_vm0, %v1124_v15  ;;  %1031 = vmatmul.mubr.msk.bf16.gmra.mrb[12].mxu1 %vm300_vm0, %v1125_v16 }
  0xf4   : > { %v1004_v17 = vpop.f32.mrb[0].mxu0  ;;  %v1020_v18 = vpop.f32.mrb[0].mxu1 }
  0xf5   : > { %v383_v19 = vpop.f32.mrb[1].mxu0  ;;  %v447_v20 = vpop.f32.mrb[1].mxu1 }
  0xf6   : > { %v1005_v21 = vpop.f32.mrb[2].mxu0  ;;  %v1021_v22 = vpop.f32.mrb[2].mxu1 }
  0xf7   : > { %v896_v23 = vpack.c.bf16 %v1005_v21, %v1004_v17  ;;  %v936_v24 = vpack.c.bf16 %v1021_v22, %v1020_v18  ;;  %v386_v25 = vpop.f32.mrb[3].mxu0  ;;  %v450_v26 = vpop.f32.mrb[3].mxu1 }
  0xf8   : > { %v891_v27 = vpack.c.bf16 %v386_v25, %v383_v19  ;;  %v931_v28 = vpack.c.bf16 %v450_v26, %v447_v20 }
  0xf9   : > { %968 = vst [vmem:[%s1361_s24 + $0x8] sm:$0xff] %v896_v23   ;;  %976 = vst [vmem:[%s1361_s24 + $0x48] sm:$0xff] %v936_v24  }
  0xfa   : > { %892 = vst [vmem:[%s1361_s24] sm:$0xff] %v891_v27   ;;  %975 = vst [vmem:[%s1361_s24 + $0x40] sm:$0xff] %v931_v28  }
  0xfc   : > { %v1008_v29 = vpop.f32.mrb[4].mxu0  ;;  %v1024_v30 = vpop.f32.mrb[4].mxu1 }
  0xfd   : > { %v399_v31 = vpop.f32.mrb[5].mxu0  ;;  %v463_v32 = vpop.f32.mrb[5].mxu1 }
  0xfe   : > { %v1009_v33 = vpop.f32.mrb[6].mxu0  ;;  %v1025_v34 = vpop.f32.mrb[6].mxu1 }
  0xff   : > { %v906_v35 = vpack.c.bf16 %v1009_v33, %v1008_v29  ;;  %v946_v36 = vpack.c.bf16 %v1025_v34, %v1024_v30  ;;  %v402_v37 = vpop.f32.mrb[7].mxu0  ;;  %v466_v38 = vpop.f32.mrb[7].mxu1 }
 0x100   : > { %v901_v39 = vpack.c.bf16 %v402_v37, %v399_v31  ;;  %v941_v40 = vpack.c.bf16 %v466_v38, %v463_v32 }
 0x101   : > { %970 = vst [vmem:[%s1361_s24 + $0x18] sm:$0xff] %v906_v35   ;;  %978 = vst [vmem:[%s1361_s24 + $0x58] sm:$0xff] %v946_v36  }
 0x102   : > { %969 = vst [vmem:[%s1361_s24 + $0x10] sm:$0xff] %v901_v39   ;;  %977 = vst [vmem:[%s1361_s24 + $0x50] sm:$0xff] %v941_v40  }
 0x104   : > { %v1012_v41 = vpop.f32.mrb[8].mxu0  ;;  %v1028_v42 = vpop.f32.mrb[8].mxu1 }
 0x105   : > { %v415_v43 = vpop.f32.mrb[9].mxu0  ;;  %v479_v44 = vpop.f32.mrb[9].mxu1 }
 0x106   : > { %v1013_v45 = vpop.f32.mrb[10].mxu0  ;;  %v1029_v46 = vpop.f32.mrb[10].mxu1 }
 0x107   : > { %v916_v47 = vpack.c.bf16 %v1013_v45, %v1012_v41  ;;  %v956_v48 = vpack.c.bf16 %v1029_v46, %v1028_v42  ;;  %v418_v49 = vpop.f32.mrb[11].mxu0  ;;  %v482_v50 = vpop.f32.mrb[11].mxu1 }
 0x108   : > { %v911_v51 = vpack.c.bf16 %v418_v49, %v415_v43  ;;  %v951_v52 = vpack.c.bf16 %v482_v50, %v479_v44 }
 0x109   : > { %972 = vst [vmem:[%s1361_s24 + $0x28] sm:$0xff] %v916_v47   ;;  %980 = vst [vmem:[%s1361_s24 + $0x68] sm:$0xff] %v956_v48  }
 0x10a   : > { %971 = vst [vmem:[%s1361_s24 + $0x20] sm:$0xff] %v911_v51   ;;  %979 = vst [vmem:[%s1361_s24 + $0x60] sm:$0xff] %v951_v52  }
 0x10c   : > { %v1016_v53 = vpop.f32.mrb[12].mxu0  ;;  %v1032_v54 = vpop.f32.mrb[12].mxu1 }
 0x10d   : > { %v431_v55 = vpop.f32.mrb[13].mxu0  ;;  %v495_v56 = vpop.f32.mrb[13].mxu1 }
 0x10e   : > { %v1017_v57 = vpop.f32.mrb[14].mxu0  ;;  %v1033_v58 = vpop.f32.mrb[14].mxu1 }
 0x10f   : > { %v926_v59 = vpack.c.bf16 %v1017_v57, %v1016_v53  ;;  %v966_v60 = vpack.c.bf16 %v1033_v58, %v1032_v54  ;;  %v434_v61 = vpop.f32.mrb[15].mxu0  ;;  %v498_v62 = vpop.f32.mrb[15].mxu1 }
 0x110   : > { %v921_v63 = vpack.c.bf16 %v434_v61, %v431_v55  ;;  %v961_v0 = vpack.c.bf16 %v498_v62, %v495_v56 }
 0x111   : > { %974 = vst [vmem:[%s1361_s24 + $0x38] sm:$0xff] %v926_v59   ;;  %982 = vst [vmem:[%s1361_s24 + $0x78] sm:$0xff] %v966_v60  }
 0x112   : > { %973 = vst [vmem:[%s1361_s24 + $0x30] sm:$0xff] %v921_v63   ;;  %981 = vst [vmem:[%s1361_s24 + $0x70] sm:$0xff] %v961_v0  }
 0x113   : > { %1139 = shalt.err (!%p1136_p7)
}
 0x114   : > { %s1140_s17 = scalar_lea.hbm %s1381_s3, 2048  ;;  %s1144_s21 = scalar_lea.hbm %s1445_s2, 12288 }
 0x115   : > { %p1141_p9 = scmp.ne.s32.totalorder %s1381_s3, %s1140_s17  ;;  %p1145_p12 = scmp.lt.u32.totalorder %s1381_s3, %s1445_s2 }
 0x116   : > { %p1146_p13 = scmp.lt.u32.totalorder %s1144_s21, %s1140_s17  ;;  %p1148_p1 = scmp.lt.u32.totalorder %s1140_s17, %s1381_s3 }
 0x117   : > { %p1142_p10 = pnand %p1141_p9, %p1291_p3 }
 0x118   : > { %p1147_p0 = por %p1146_p13, %p1145_p12 }
 0x119   : > { %p1143_p11 = pneg %p1142_p10 }
 0x11a   : > { %p1149_p2 = por %p1148_p1, %p1147_p0 }
 0x11c   : > { %p1150_p4 = pnand %p1149_p2, %p1143_p11 }
 0x11e   : > { %1153 = shalt.err (!%p1150_p4)
}
 0x11f   : > { %s1223_s26 = smov 64   ;;  %s1224_s29 = smov 4  }
 0x120   : > { %1036 = dma.vmem_to_hbm [thread:$0]  (%p1291_p3), %s1383_s30, 2048, %s1381_s3, %s1391_s4, %s1223_s26, %s1223_s26, %s1224_s29  }
 0x121 PF: > { %p1042_p5 = scmp.ge.s32.totalorder %s1220_s16, 2  ;;  %s701_s12 = sand.u32 1, %s1192_s9  }
 0x122   : > { %s702_s28 = scalar_lea.sflag [#allocation3], %s701_s12 }
 0x123   : > { %p1039_p6 = pnand %p1042_p5, %p1300_p8 }
 0x125   : > { %1187 = dma.done.wait (!%p1039_p6), %s702_s28, 2048  }
 0x126   : > { %1189 = vsyncadd (!%p1039_p6), %s702_s28, 4294965248  ;;  %s15_s16 = sadd.s32 1, %s1220_s16   ;;  %s1448_s9 = smov %s1196_s10 }
 0x127   : > { %p12_p7 = scmp.ge.s32.totalorder %s15_s16, 8   ;;  %s1449_s10 = smov %s1200_s11 }
 0x128   : > { %s1450_s11 = smov %s1309_s27  ;;  %s1451_s12 = smov %s1212_s14 }
 0x129   : > { %s1452_s13 = smov %s1216_s15  ;;  %s1453_s14 = smov %s1456_s19 }
 0x12a   : > { %s1454_s15 = smov %s1460_s20  ;;  %14 = sbr.rel (!%p12_p7) target bundleno = 5 (0x5), region = 66 }
 0x131   :  { %707 = vsyncpa [#allocation3], 1 }
 0x132   :  { %709 = vsyncpa [#allocation3 + $0x1], 1 }

</bundles_post_ra>
